<compile_context>
chip_gen: v6e
topology: v6e:2x2x1
jax: 0.10.0
libtpu: 0.0.40
codegen_flags: <defaults>
</compile_context>

<pallas_src>
import jax
import jax.numpy as jnp
from jax.experimental import pallas as pl
from jax.experimental.pallas import tpu as pltpu

_LANE = 128


def _softplus_kernel(x_ref, o_ref):
    # log(1 + exp(x)) computed stably in f32: max(x, 0) + log1p(exp(-|x|)).
    # (Identical function, but does not overflow to inf for x >~ 88.7.)
    x = x_ref[...].astype(jnp.float32)
    y = jnp.maximum(x, 0.0) + jnp.log1p(jnp.exp(-jnp.abs(x)))
    o_ref[...] = y.astype(o_ref.dtype)


def mish_forward(x: jax.Array, *, max_block_bytes: int = 2 * 1024 * 1024) -> jax.Array:
    """Elementwise log(1 + exp(x)) (softplus) on TPU via Pallas."""
    orig_shape = x.shape
    dtype = x.dtype
    itemsize = jnp.dtype(dtype).itemsize
    n = x.size

    # Sublane multiple for the (sublane, lane) tiling constraint:
    # 8 for 4-byte, 16 for 2-byte, 32 for 1-byte element types.
    sublane = max(8, 32 // itemsize)
    pad_unit = sublane * _LANE

    x_flat = x.reshape(-1)  # free (contiguous) reshape, no HBM pass
    n_pad = (-n) % pad_unit
    if n_pad:
        # Rare path: pad only when the flat size is not already a multiple of the
        # minimal (sublane, 128) tile (typical conv activation sizes already are,
        # so the extra HBM pass from jnp.pad is avoided in the common case).
        x_flat = jnp.pad(x_flat, (0, n_pad))
    n_padded = n + n_pad
    rows = n_padded // _LANE
    x2d = x_flat.reshape(rows, _LANE)

    # Tile rows: largest block up to ~max_block_bytes, multiple of `sublane`,
    # never degrading below the minimum (sublane, 128) tile. Ragged tail is
    # handled by a cdiv grid with Pallas's masked last block (no extra padding).
    tr_cap = max(sublane, (max_block_bytes // (_LANE * itemsize)) // sublane * sublane)
    tr = min(tr_cap, rows)
    grid = (pl.cdiv(rows, tr),)

    out2d = pl.pallas_call(
        _softplus_kernel,
        out_shape=jax.ShapeDtypeStruct((rows, _LANE), dtype),
        grid_spec=pltpu.PrefetchScalarGridSpec(
            num_scalar_prefetch=0,
            grid=grid,
            in_specs=[pl.BlockSpec((tr, _LANE), lambda i: (i, 0))],
            out_specs=pl.BlockSpec((tr, _LANE), lambda i: (i, 0)),
        ),
        compiler_params=pltpu.CompilerParams(
            dimension_semantics=("parallel",),  # shards row-grid across v7x's 2 TCs
        ),
        cost_estimate=pl.CostEstimate(
            flops=3 * n,                      # max / abs / add VPU work
            transcendentals=2 * n,            # exp + log1p per element
            bytes_accessed=2 * n * itemsize,  # one read + one write
        ),
    )(x2d)

    # No .astype needed: output dtype already matches the input dtype.
    if n_pad:
        out = out2d.reshape(-1)[:n].reshape(orig_shape)
    else:
        out = out2d.reshape(orig_shape)
    return out


if __name__ == "__main__":
    key = jax.random.PRNGKey(0)
    # Small NCHW input consistent with a typical conv-style activation usage.
    x = jax.random.normal(key, (2, 4, 16, 16), dtype=jnp.float32)

    y = jax.block_until_ready(mish_forward(x))

    # Sanity check against the literal reference form (safe at these magnitudes).
    y_ref = jnp.log(1.0 + jnp.exp(x))
    assert y.shape == x.shape and y.dtype == x.dtype
    assert jnp.max(jnp.abs(y - y_ref)) < 1e-5

    print("KERNEL_OK")
</pallas_src>

<mosaic_0001>
module attributes {stable_mosaic.version = 11 : i64} {
  func.func @_softplus_kernel(%arg0: i32, %arg1: memref<16x128xf32, #tpu.memory_space<vmem>>, %arg2: memref<16x128xf32, #tpu.memory_space<vmem>>) attributes {dimension_semantics = [#tpu.dimension_semantics<parallel>], iteration_bounds = array<i64: 1>, scalar_prefetch = 0 : i64, scratch_operands = 0 : i64, tpu.core_type = #tpu.core_type<tc>, window_params = [{transform_indices = @transform_0, window_bounds = array<i64: 16, 128>}, {transform_indices = @transform_1, window_bounds = array<i64: 16, 128>}]} {
    %c0 = arith.constant 0 : index
    %c0_0 = arith.constant 0 : index
    %0 = vector.load %arg1[%c0, %c0_0] : memref<16x128xf32, #tpu.memory_space<vmem>>, vector<16x128xf32>
    %cst = arith.constant 0.000000e+00 : f32
    %1 = vector.broadcast %cst : f32 to vector<16x128xf32>
    %2 = arith.maximumf %0, %1 : vector<16x128xf32>
    %3 = math.absf %0 : vector<16x128xf32>
    %cst_1 = arith.constant 0.000000e+00 : f32
    %4 = vector.broadcast %cst_1 : f32 to vector<16x128xf32>
    %5 = arith.subf %4, %3 : vector<16x128xf32>
    %6 = math.exp %5 : vector<16x128xf32>
    %7 = math.log1p %6 : vector<16x128xf32>
    %8 = arith.addf %2, %7 : vector<16x128xf32>
    %c0_2 = arith.constant 0 : index
    %c0_3 = arith.constant 0 : index
    %9 = vector.load %arg2[%c0_2, %c0_3] : memref<16x128xf32, #tpu.memory_space<vmem>>, vector<16x128xf32>
    tpu.vector_store %arg2[%c0_2, %c0_3], %8 {strides = array<i32>} : memref<16x128xf32, #tpu.memory_space<vmem>>, vector<16x128xf32>,
    return
  }
  func.func @transform_0(%arg0: i32) -> (i32, i32) {
    %c0_i32 = arith.constant 0 : i32
    %c0_i32_0 = arith.constant 0 : i32
    return %arg0, %c0_i32 : i32, i32
  }
  func.func @transform_1(%arg0: i32) -> (i32, i32) {
    %c0_i32 = arith.constant 0 : i32
    %c0_i32_0 = arith.constant 0 : i32
    return %arg0, %c0_i32 : i32, i32
  }
}

</mosaic_0001>

<bundles_post_ra>
// kernel: tpu_custom_call.1
= control target key start
LH: loop header
LB: loop body
LE: loop exit
PB: predicated region body
PF: predicated region fallthrough
CT: control target
= control target key end

     0   :  { %6 = vsyncpa [#allocation3], 0  ;;  %s156_s0 = inlined_call_operand.hbm [shape: f32[16,128], index: 0, kind: input, shape index: {}]   ;;  %s157_s1 = inlined_call_operand.hbm [shape: f32[16,128], index: 1, kind: output, shape index: {}]  }
   0x1   :  { %7 = vsyncpa [#allocation4], 0  ;;  %s130_s6 = smov [#allocation2]  }
   0x2   :  { %s13_s7 = sshll.u32 %s130_s6, 4  ;;  %s14_s7 = int_to_ptr.vmem [resolvable:$true] %s13_s7 }
   0x3   :  { %s94_s8 = scalar_lea.vmem %s14_s7, 256  ;;  %p99_p1 = scmp.lt.s32.totalorder %s14_s7, %s14_s7 }
   0x4   :  { %p95_p0 = scmp.ne.s32.totalorder %s14_s7, %s94_s8  ;;  %p100_p2 = scmp.lt.s32.totalorder %s94_s8, %s94_s8 }
   0x6   :  { %p101_p3 = por %p100_p2, %p99_p1 }
   0x8   :  { %p102_p4 = pnand %p101_p3, %p95_p0 }
   0xa   :  { %105 = shalt.err (!%p102_p4)
}
   0xb   :  { %s131_s9 = smov 128   ;;  %s132_s10 = smov 8  }
   0xc   :  { %19 = dma.hbm_to_vmem [thread:$0]  %s156_s0, 256, %s14_s7, [#allocation3], %s131_s9, %s131_s9, %s132_s10  }
   0xd   :  { %126 = dma.done.wait [#allocation3], 256  }
   0xe   :  { %127 = vsyncadd [#allocation3], 4294967040  ;;  %v23_v0 = vld [vmem:[#allocation2] sm:$0xff]  ;;  %v24_v1 = vld [vmem:[#allocation2 + $0x8] sm:$0xff]  ;;  %s133_s0 = smov [#allocation5]  }
   0xf   :  { %v27_v2 = vand.u32 2147483647, %v23_v0  ;;  %v28_v3 = vand.u32 2147483647, %v24_v1  ;;  %v25_v20 = vmax.f32 %v23_v0, 0.0  ;;  %v26_v24 = vmax.f32 %v24_v1, 0.0 }
  0x10   :  { %s62_s13 = sshll.u32 %s133_s0, 4  ;;  %s63_s13 = int_to_ptr.vmem [resolvable:$true] %s62_s13 }
  0x11   :  { %v29_v4 = vsub.f32 0.0, %v27_v2  ;;  %v30_v5 = vsub.f32 0.0, %v28_v3  ;;  %s106_s14 = scalar_lea.vmem %s63_s13, 256  ;;  %p111_p6 = scmp.lt.s32.totalorder %s63_s13, %s63_s13 }
  0x12   :  { %p107_p5 = scmp.ne.s32.totalorder %s63_s13, %s106_s14  ;;  %p112_p7 = scmp.lt.s32.totalorder %s106_s14, %s106_s14 }
  0x13   :  { %v31_v6 = vmul.f32 1.442695, %v29_v4  ;;  %v33_v7 = vmul.f32 1.442695, %v30_v5 }
  0x14   :  { %p113_p8 = por %p112_p7, %p111_p6 }
  0x15   :  { %78 = vpow2.f32 %v31_v6 }
  0x16   :  { %80 = vpow2.f32 %v33_v7  ;;  %p114_p9 = pnand %p113_p8, %p107_p5 }
  0x22   :  { %v79_v8 = vpop.eup %78 }
  0x23   :  { %v81_v9 = vpop.eup %80  ;;  %v35_v10 = vadd.f32 1.0, %v79_v8  ;;  %v38_v12 = vmul.f32 -0.5, %v79_v8  ;;  %v41_v15 = vand.u32 2147483647, %v79_v8 }
  0x24   :  { %v44_v11 = vadd.f32 1.0, %v81_v9  ;;  %v47_v13 = vmul.f32 -0.5, %v81_v9  ;;  %v50_v17 = vand.u32 2147483647, %v81_v9 }
  0x25   :  { %82 = vlog2.f32 %v35_v10  ;;  %v39_v14 = vadd.f32 1.0, %v38_v12  ;;  %vm42_vm0 = vcmp.lt.f32.partialorder %v41_v15, 0.0004427343 }
  0x26   :  { %84 = vlog2.f32 %v44_v11  ;;  %v48_v16 = vadd.f32 1.0, %v47_v13  ;;  %vm51_vm1 = vcmp.lt.f32.partialorder %v50_v17, 0.0004427343 }
  0x27   :  { %v40_v18 = vmul.f32 %v79_v8, %v39_v14 }
  0x28   :  { %v49_v21 = vmul.f32 %v81_v9, %v48_v16 }
  0x32   :  { %v83_v19 = vpop.eup %82 }
  0x33   :  { %v85_v22 = vpop.eup %84  ;;  %v37_v23 = vmul.f32 0.6931472, %v83_v19 }
  0x34   :  { %v46_v25 = vmul.f32 0.6931472, %v85_v22 }
  0x35   :  { %v43_v26 = vsel %vm42_vm0, %v40_v18, %v37_v23 }
  0x36   :  { %v53_v27 = vadd.f32 %v43_v26, %v25_v20  ;;  %v52_v28 = vsel %vm51_vm1, %v49_v21, %v46_v25 }
  0x37   :  { %v54_v29 = vadd.f32 %v52_v28, %v26_v24 }
  0x38   :  { %55 = vst [vmem:[#allocation5] sm:$0xff] %v53_v27 }
  0x39   :  { %56 = vst [vmem:[#allocation5 + $0x8] sm:$0xff] %v54_v29 }
  0x3a   :  { %117 = shalt.err (!%p114_p9)
}
  0x3b   :  { %68 = dma.vmem_to_hbm [thread:$0]  %s63_s13, 256, %s157_s1, [#allocation4], %s131_s9, %s131_s9, %s132_s10  }
  0x3c   :  { %128 = dma.done.wait [#allocation4], 256  }
  0x3d   :  { %129 = vsyncadd [#allocation4], 4294967040 }
  0x3e   :  { %72 = vsyncpa [#allocation3], 1 }
  0x3f   :  { %73 = vsyncpa [#allocation4], 1 }

</bundles_post_ra>
